<compile_context>
chip_gen: v7x
topology: tpu7x:2x2x1
jax: 0.10.0
libtpu: 0.0.40
codegen_flags: <defaults>
</compile_context>

<pallas_src>
import jax
import jax.numpy as jnp
from jax.experimental import pallas as pl
from jax.experimental.pallas import tpu as pltpu

LANE = 128        # lane width -- every feature dim is padded to this
MAX_TILE = 512    # A_hat tile edge once N grows past 512 (~85% of HBM roofline)


def _round_up(x, m):
    return ((x + m - 1) // m) * m


def _choose_tiles(n):
    """Pick (n_pad, tm, tk): 512-wide tiles for large N, single block otherwise."""
    n_pad = _round_up(max(n, 1), LANE)
    if n_pad <= MAX_TILE:
        return n_pad, n_pad, n_pad
    n_pad = _round_up(n_pad, MAX_TILE)
    return n_pad, MAX_TILE, MAX_TILE


def _vmem_budget(tm, tk):
    """Scoped-VMEM request: double-buffered tiles + resident params + accumulator."""
    a_blk = tm * tk * 2              # bf16 A tile
    x_blk = tk * LANE * 2            # bf16 activation tile
    o_blk = tm * LANE * 4            # f32 output tile (worst case)
    params = 3 * (LANE * LANE * 2 + LANE * 4)
    acc = tm * LANE * 4
    need = 2 * (a_blk + x_blk + o_blk) + params + acc
    return int(min(need + (8 << 20), 48 << 20))   # headroom, stay < v7x's 64 MiB


# ----------------------------------------------------------------------------
# Kernels
# ----------------------------------------------------------------------------
def _gcn_layer_kernel(a_ref, x_ref, w_ref, b_ref, o_ref, acc_ref):
    """One (row-block, k-block) step of  relu(A @ (X @ W) + b)."""
    k = pl.program_id(1)

    @pl.when(k == 0)
    def _():
        acc_ref[...] = jnp.zeros_like(acc_ref)

    xw = jnp.dot(x_ref[...], w_ref[...], preferred_element_type=jnp.float32)
    acc_ref[...] += jnp.dot(a_ref[...], xw.astype(a_ref.dtype),
                            preferred_element_type=jnp.float32)

    @pl.when(k == pl.num_programs(1) - 1)
    def _():
        h = jnp.maximum(acc_ref[...] + b_ref[...], 0.0)       # f32 elementwise
        o_ref[...] = h.astype(o_ref.dtype)


def _gcn_layer_out_kernel(a_ref, h_ref, w2_ref, b2_ref, w3_ref, b3_ref,
                          o_ref, acc_ref):
    """One (row-block, k-block) step of  tanh(relu(A @ (H @ W2) + b2) @ W3 + b3)."""
    k = pl.program_id(1)

    @pl.when(k == 0)
    def _():
        acc_ref[...] = jnp.zeros_like(acc_ref)

    hw = jnp.dot(h_ref[...], w2_ref[...], preferred_element_type=jnp.float32)
    acc_ref[...] += jnp.dot(a_ref[...], hw.astype(a_ref.dtype),
                            preferred_element_type=jnp.float32)

    @pl.when(k == pl.num_programs(1) - 1)
    def _():
        h2 = jnp.maximum(acc_ref[...] + b2_ref[...], 0.0)     # f32 elementwise
        y = jnp.dot(h2.astype(w3_ref.dtype), w3_ref[...],
                    preferred_element_type=jnp.float32) + b3_ref[...]
        o_ref[...] = jnp.tanh(y).astype(o_ref.dtype)


# ----------------------------------------------------------------------------
# pallas_call wrappers (one per layer)
# ----------------------------------------------------------------------------
def _gcn_layer(a_hat, x_p, w_p, b_p, *, n_pad, tm, tk):
    gi, gk = n_pad // tm, n_pad // tk
    cp = LANE
    flops = 2 * n_pad * n_pad * cp + 2 * gi * n_pad * cp * cp
    bytes_acc = (n_pad * n_pad * 2                # A (bf16)
                 + gi * n_pad * cp * 2            # X re-read per row block
                 + cp * cp * 2 + cp * 4           # W, b
                 + n_pad * cp * 2)                # H1 out (bf16)
    return pl.pallas_call(
        _gcn_layer_kernel,
        out_shape=jax.ShapeDtypeStruct((n_pad, cp), jnp.bfloat16),
        grid_spec=pltpu.PrefetchScalarGridSpec(
            num_scalar_prefetch=0,
            grid=(gi, gk),
            in_specs=[
                pl.BlockSpec((tm, tk), lambda i, k: (i, k)),   # A_hat tile
                pl.BlockSpec((tk, cp), lambda i, k: (k, 0)),   # X rows for k-block
                pl.BlockSpec((cp, cp), lambda i, k: (0, 0)),   # W (resident)
                pl.BlockSpec((1, cp), lambda i, k: (0, 0)),    # b (resident)
            ],
            out_specs=pl.BlockSpec((tm, cp), lambda i, k: (i, 0)),
            scratch_shapes=[pltpu.VMEM((tm, cp), jnp.float32)],
        ),
        compiler_params=pltpu.CompilerParams(
            dimension_semantics=("parallel", "arbitrary"),
            vmem_limit_bytes=_vmem_budget(tm, tk)),
        cost_estimate=pl.CostEstimate(flops=int(flops), transcendentals=0,
                                      bytes_accessed=int(bytes_acc)),
    )(a_hat, x_p, w_p, b_p)


def _gcn_layer_out(a_hat, h_p, w2_p, b2_p, w3_p, b3_p, *, n_pad, tm, tk):
    gi, gk = n_pad // tm, n_pad // tk
    cp = LANE
    flops = (2 * n_pad * n_pad * cp + 2 * gi * n_pad * cp * cp
             + 2 * n_pad * cp * cp)               # + fused final linear
    bytes_acc = (n_pad * n_pad * 2
                 + gi * n_pad * cp * 2
                 + 2 * (cp * cp * 2 + cp * 4)
                 + n_pad * cp * 4)                # f32 lane-dense output
    return pl.pallas_call(
        _gcn_layer_out_kernel,
        out_shape=jax.ShapeDtypeStruct((n_pad, cp), jnp.float32),
        grid_spec=pltpu.PrefetchScalarGridSpec(
            num_scalar_prefetch=0,
            grid=(gi, gk),
            in_specs=[
                pl.BlockSpec((tm, tk), lambda i, k: (i, k)),   # A_hat tile
                pl.BlockSpec((tk, cp), lambda i, k: (k, 0)),   # H1 rows for k-block
                pl.BlockSpec((cp, cp), lambda i, k: (0, 0)),   # W2
                pl.BlockSpec((1, cp), lambda i, k: (0, 0)),    # b2
                pl.BlockSpec((cp, cp), lambda i, k: (0, 0)),   # W3
                pl.BlockSpec((1, cp), lambda i, k: (0, 0)),    # b3
            ],
            out_specs=pl.BlockSpec((tm, cp), lambda i, k: (i, 0)),
            scratch_shapes=[pltpu.VMEM((tm, cp), jnp.float32)],
        ),
        compiler_params=pltpu.CompilerParams(
            dimension_semantics=("parallel", "arbitrary"),
            vmem_limit_bytes=_vmem_budget(tm, tk)),
        cost_estimate=pl.CostEstimate(flops=int(flops),
                                      transcendentals=int(n_pad * cp),
                                      bytes_accessed=int(bytes_acc)),
    )(a_hat, h_p, w2_p, b2_p, w3_p, b3_p)


# ----------------------------------------------------------------------------
# JAX glue: GCN-normalized dense adjacency, built directly in bf16 at padded
# size.  Matches PyG gcn_norm / add_remaining_self_loops semantics: existing
# self-loops keep their weight, missing ones are added with weight 1.
# TODO(synk): the degree / normalization scatter has no clean Pallas
# equivalent (data-dependent scatter-add); it stays in JAX.
# ----------------------------------------------------------------------------
def build_normalized_adjacency(edge_index, edge_weight, num_nodes, n_pad):
    src = edge_index[0]
    dst = edge_index[1]
    w = edge_weight.astype(jnp.float32)

    is_loop = src == dst
    # add_remaining_self_loops: keep existing self-loop weights, fill missing with 1.
    loop_w = jnp.ones((num_nodes,), jnp.float32)
    loop_w = loop_w.at[jnp.where(is_loop, src, num_nodes)].set(
        jnp.where(is_loop, w, 0.0), mode="drop")
    w = jnp.where(is_loop, 0.0, w)            # original self-loop edges replaced

    loop = jnp.arange(num_nodes, dtype=src.dtype)
    src_all = jnp.concatenate([src, loop])
    dst_all = jnp.concatenate([dst, loop])
    w_all = jnp.concatenate([w, loop_w])

    deg = jnp.zeros((num_nodes,), jnp.float32).at[dst_all].add(w_all)
    deg_inv_sqrt = jnp.where(deg > 0, jax.lax.rsqrt(deg), 0.0)
    norm = deg_inv_sqrt[src_all] * w_all * deg_inv_sqrt[dst_all]

    # out[dst] += norm * x[src]  ==>  A_hat[dst, src] = norm ; build bf16, padded.
    a_hat = jnp.zeros((n_pad, n_pad), jnp.bfloat16).at[dst_all, src_all].add(
        norm.astype(jnp.bfloat16))
    return a_hat


def _pad2(x, rows, cols):
    return jnp.pad(x, ((0, rows - x.shape[0]), (0, cols - x.shape[1])))


# ----------------------------------------------------------------------------
# Parameters (stored pre-transposed: W as [in, out], b as [1, out], f32)
# ----------------------------------------------------------------------------
def init_params(key, in_channels, gcn_channels, out_channels):
    k1, k2, k3 = jax.random.split(key, 3)

    def glorot(k, fan_in, fan_out):
        lim = jnp.sqrt(6.0 / (fan_in + fan_out))
        return jax.random.uniform(k, (fan_in, fan_out), jnp.float32, -lim, lim)

    w1 = glorot(k1, in_channels, gcn_channels)
    b1 = jnp.zeros((1, gcn_channels), jnp.float32)
    w2 = glorot(k2, gcn_channels, gcn_channels)
    b2 = jnp.zeros((1, gcn_channels), jnp.float32)
    w3 = glorot(k3, gcn_channels, out_channels)
    b3 = jnp.zeros((1, out_channels), jnp.float32)
    return w1, b1, w2, b2, w3, b3


def vanilla_gcn_encoder(x, edge_index, edge_weight, params):
    w1, b1, w2, b2, w3, b3 = params
    n = x.shape[0]
    c_out = w3.shape[1]
    n_pad, tm, tk = _choose_tiles(n)
    cp = LANE

    a_hat = build_normalized_adjacency(edge_index, edge_weight, n, n_pad)

    # Pad feature dims to 128 lanes once; cast MXU operands to bf16.
    x_p = _pad2(x.astype(jnp.bfloat16), n_pad, cp)
    w1_p = _pad2(w1, cp, cp).astype(jnp.bfloat16)
    b1_p = _pad2(b1, 1, cp)
    w2_p = _pad2(w2, cp, cp).astype(jnp.bfloat16)
    b2_p = _pad2(b2, 1, cp)
    w3_p = _pad2(w3, cp, cp).astype(jnp.bfloat16)
    b3_p = _pad2(b3, 1, cp)

    h1 = _gcn_layer(a_hat, x_p, w1_p, b1_p, n_pad=n_pad, tm=tm, tk=tk)
    y = _gcn_layer_out(a_hat, h1, w2_p, b2_p, w3_p, b3_p,
                       n_pad=n_pad, tm=tm, tk=tk)
    return y[:n, :c_out]


if __name__ == "__main__":
    key = jax.random.PRNGKey(0)
    k_x, k_ei, k_ew, k_p = jax.random.split(key, 4)

    num_nodes = 16
    in_channels = 4
    gcn_channels = 32
    out_channels = 8
    num_edges = 40

    x = jax.random.normal(k_x, (num_nodes, in_channels), jnp.float32)
    edge_index = jax.random.randint(k_ei, (2, num_edges), 0, num_nodes, jnp.int32)
    edge_weight = jax.random.uniform(k_ew, (num_edges,), jnp.float32, 0.1, 1.0)

    params = init_params(k_p, in_channels, gcn_channels, out_channels)

    encoder = jax.jit(vanilla_gcn_encoder)
    out = encoder(x, edge_index, edge_weight, params)
    jax.block_until_ready(out)

    # Pure-JAX reference (same adjacency, f32 math) for a correctness check.
    n_pad, _, _ = _choose_tiles(num_nodes)
    a_ref = build_normalized_adjacency(
        edge_index, edge_weight, num_nodes, n_pad)[:num_nodes, :num_nodes]
    a_ref = a_ref.astype(jnp.float32)
    w1, b1, w2, b2, w3, b3 = params
    h1r = jax.nn.relu(a_ref @ (x @ w1) + b1)
    h2r = jax.nn.relu(a_ref @ (h1r @ w2) + b2)
    ref = jnp.tanh(h2r @ w3 + b3)

    assert out.shape == (num_nodes, out_channels)
    assert bool(jnp.all(jnp.isfinite(out)))
    assert bool(jnp.all(jnp.abs(out) <= 1.0))                 # tanh range
    assert float(jnp.max(jnp.abs(out - ref))) < 5e-2          # bf16 MXU tolerance
    print("KERNEL_OK")
</pallas_src>

<mosaic_0001>
module attributes {stable_mosaic.version = 11 : i64} {
  func.func @_gcn_layer_kernel(%arg0: i32, %arg1: i32, %arg2: memref<128x128xbf16, #tpu.memory_space<vmem>>, %arg3: memref<128x128xbf16, #tpu.memory_space<vmem>>, %arg4: memref<128x128xbf16, #tpu.memory_space<vmem>>, %arg5: memref<1x128xf32, #tpu.memory_space<vmem>>, %arg6: memref<128x128xbf16, #tpu.memory_space<vmem>>, %arg7: memref<128x128xf32, #tpu.memory_space<vmem>>) attributes {dimension_semantics = [#tpu.dimension_semantics<parallel>, #tpu.dimension_semantics<arbitrary>], iteration_bounds = array<i64: 1, 1>, scalar_prefetch = 0 : i64, scratch_operands = 1 : i64, tpu.core_type = #tpu.core_type<tc>, window_params = [{transform_indices = @transform_0, window_bounds = array<i64: 128, 128>}, {transform_indices = @transform_1, window_bounds = array<i64: 128, 128>}, {pipeline_mode = #tpu.pipeline_mode<synchronous>, transform_indices = @transform_2, window_bounds = array<i64: 128, 128>}, {pipeline_mode = #tpu.pipeline_mode<synchronous>, transform_indices = @transform_3, window_bounds = array<i64: 1, 128>}, {transform_indices = @transform_4, window_bounds = array<i64: 128, 128>}]} {
    %c0_i32 = arith.constant 0 : i32
    %0 = arith.cmpi eq, %arg1, %c0_i32 : i32
    %1 = arith.extui %0 : i1 to i32
    %c0_i32_0 = arith.constant 0 : i32
    %2 = arith.cmpi ne, %1, %c0_i32_0 : i32
    scf.if %2 {
      %cst_13 = arith.constant 0.000000e+00 : f32
      %15 = vector.broadcast %cst_13 : f32 to vector<128x128xf32>
      %c0_14 = arith.constant 0 : index
      %c0_15 = arith.constant 0 : index
      %16 = vector.load %arg7[%c0_14, %c0_15] : memref<128x128xf32, #tpu.memory_space<vmem>>, vector<128x128xf32>
      tpu.vector_store %arg7[%c0_14, %c0_15], %15 {strides = array<i32>} : memref<128x128xf32, #tpu.memory_space<vmem>>, vector<128x128xf32>,
    } else {
    }
    %c0 = arith.constant 0 : index
    %c0_1 = arith.constant 0 : index
    %3 = vector.load %arg3[%c0, %c0_1] : memref<128x128xbf16, #tpu.memory_space<vmem>>, vector<128x128xbf16>
    %c0_2 = arith.constant 0 : index
    %c0_3 = arith.constant 0 : index
    %4 = vector.load %arg4[%c0_2, %c0_3] : memref<128x128xbf16, #tpu.memory_space<vmem>>, vector<128x128xbf16>
    %cst = arith.constant dense<0.000000e+00> : vector<128x128xf32>
    %5 = tpu.matmul %3, %4, %cst {dimension_numbers = #tpu.dot_dimension_numbers<[1], [0], [0], [1], [0, 0, 1, 1], [], []>} : vector<128x128xbf16>, vector<128x128xbf16>, vector<128x128xf32> -> vector<128x128xf32>
    %c0_4 = arith.constant 0 : index
    %c0_5 = arith.constant 0 : index
    %6 = vector.load %arg7[%c0_4, %c0_5] : memref<128x128xf32, #tpu.memory_space<vmem>>, vector<128x128xf32>
    %c0_6 = arith.constant 0 : index
    %c0_7 = arith.constant 0 : index
    %7 = vector.load %arg2[%c0_6, %c0_7] : memref<128x128xbf16, #tpu.memory_space<vmem>>, vector<128x128xbf16>
    %8 = arith.truncf %5 : vector<128x128xf32> to vector<128x128xbf16>
    %cst_8 = arith.constant dense<0.000000e+00> : vector<128x128xf32>
    %9 = tpu.matmul %7, %8, %cst_8 {dimension_numbers = #tpu.dot_dimension_numbers<[1], [0], [0], [1], [0, 0, 1, 1], [], []>} : vector<128x128xbf16>, vector<128x128xbf16>, vector<128x128xf32> -> vector<128x128xf32>
    %10 = arith.addf %6, %9 : vector<128x128xf32>
    %c0_9 = arith.constant 0 : index
    %c0_10 = arith.constant 0 : index
    %11 = vector.load %arg7[%c0_9, %c0_10] : memref<128x128xf32, #tpu.memory_space<vmem>>, vector<128x128xf32>
    tpu.vector_store %arg7[%c0_9, %c0_10], %10 {strides = array<i32>} : memref<128x128xf32, #tpu.memory_space<vmem>>, vector<128x128xf32>,
    %c0_i32_11 = arith.constant 0 : i32
    %12 = arith.cmpi eq, %arg1, %c0_i32_11 : i32
    %13 = arith.extui %12 : i1 to i32
    %c0_i32_12 = arith.constant 0 : i32
    %14 = arith.cmpi ne, %13, %c0_i32_12 : i32
    scf.if %14 {
      %c0_13 = arith.constant 0 : index
      %c0_14 = arith.constant 0 : index
      %15 = vector.load %arg7[%c0_13, %c0_14] : memref<128x128xf32, #tpu.memory_space<vmem>>, vector<128x128xf32>
      %c0_15 = arith.constant 0 : index
      %c0_16 = arith.constant 0 : index
      %16 = vector.load %arg5[%c0_15, %c0_16] : memref<1x128xf32, #tpu.memory_space<vmem>>, vector<1x128xf32>
      %17 = vector.broadcast %16 : vector<1x128xf32> to vector<128x128xf32>
      %18 = arith.addf %15, %17 : vector<128x128xf32>
      %cst_17 = arith.constant 0.000000e+00 : f32
      %19 = vector.broadcast %cst_17 : f32 to vector<128x128xf32>
      %20 = arith.maximumf %18, %19 : vector<128x128xf32>
      %21 = arith.truncf %20 : vector<128x128xf32> to vector<128x128xbf16>
      %c0_18 = arith.constant 0 : index
      %c0_19 = arith.constant 0 : index
      %22 = vector.load %arg6[%c0_18, %c0_19] : memref<128x128xbf16, #tpu.memory_space<vmem>>, vector<128x128xbf16>
      tpu.vector_store %arg6[%c0_18, %c0_19], %21 {strides = array<i32>} : memref<128x128xbf16, #tpu.memory_space<vmem>>, vector<128x128xbf16>,
    } else {
    }
    return
  }
  func.func @transform_0(%arg0: i32, %arg1: i32) -> (i32, i32) {
    %c0_i32 = arith.constant 0 : i32
    return %arg0, %arg1 : i32, i32
  }
  func.func @transform_1(%arg0: i32, %arg1: i32) -> (i32, i32) {
    %c0_i32 = arith.constant 0 : i32
    %c0_i32_0 = arith.constant 0 : i32
    return %arg1, %c0_i32 : i32, i32
  }
  func.func @transform_2(%arg0: i32, %arg1: i32) -> (i32, i32) {
    %c0_i32 = arith.constant 0 : i32
    %c0_i32_0 = arith.constant 0 : i32
    %c0_i32_1 = arith.constant 0 : i32
    return %c0_i32, %c0_i32_0 : i32, i32
  }
  func.func @transform_3(%arg0: i32, %arg1: i32) -> (i32, i32) {
    %c0_i32 = arith.constant 0 : i32
    %c0_i32_0 = arith.constant 0 : i32
    %c0_i32_1 = arith.constant 0 : i32
    return %c0_i32, %c0_i32_0 : i32, i32
  }
  func.func @transform_4(%arg0: i32, %arg1: i32) -> (i32, i32) {
    %c0_i32 = arith.constant 0 : i32
    %c0_i32_0 = arith.constant 0 : i32
    return %arg0, %c0_i32 : i32, i32
  }
}

module attributes {stable_mosaic.version = 11 : i64} {
  func.func @_gcn_layer_out_kernel(%arg0: i32, %arg1: i32, %arg2: memref<128x128xbf16, #tpu.memory_space<vmem>>, %arg3: memref<128x128xbf16, #tpu.memory_space<vmem>>, %arg4: memref<128x128xbf16, #tpu.memory_space<vmem>>, %arg5: memref<1x128xf32, #tpu.memory_space<vmem>>, %arg6: memref<128x128xbf16, #tpu.memory_space<vmem>>, %arg7: memref<1x128xf32, #tpu.memory_space<vmem>>, %arg8: memref<128x128xf32, #tpu.memory_space<vmem>>, %arg9: memref<128x128xf32, #tpu.memory_space<vmem>>) attributes {dimension_semantics = [#tpu.dimension_semantics<parallel>, #tpu.dimension_semantics<arbitrary>], iteration_bounds = array<i64: 1, 1>, scalar_prefetch = 0 : i64, scratch_operands = 1 : i64, tpu.core_type = #tpu.core_type<tc>, window_params = [{transform_indices = @transform_0, window_bounds = array<i64: 128, 128>}, {transform_indices = @transform_1, window_bounds = array<i64: 128, 128>}, {pipeline_mode = #tpu.pipeline_mode<synchronous>, transform_indices = @transform_2, window_bounds = array<i64: 128, 128>}, {pipeline_mode = #tpu.pipeline_mode<synchronous>, transform_indices = @transform_3, window_bounds = array<i64: 1, 128>}, {pipeline_mode = #tpu.pipeline_mode<synchronous>, transform_indices = @transform_4, window_bounds = array<i64: 128, 128>}, {pipeline_mode = #tpu.pipeline_mode<synchronous>, transform_indices = @transform_5, window_bounds = array<i64: 1, 128>}, {transform_indices = @transform_6, window_bounds = array<i64: 128, 128>}]} {
    %c0_i32 = arith.constant 0 : i32
    %0 = arith.cmpi eq, %arg1, %c0_i32 : i32
    %1 = arith.extui %0 : i1 to i32
    %c0_i32_0 = arith.constant 0 : i32
    %2 = arith.cmpi ne, %1, %c0_i32_0 : i32
    scf.if %2 {
      %cst_13 = arith.constant 0.000000e+00 : f32
      %15 = vector.broadcast %cst_13 : f32 to vector<128x128xf32>
      %c0_14 = arith.constant 0 : index
      %c0_15 = arith.constant 0 : index
      %16 = vector.load %arg9[%c0_14, %c0_15] : memref<128x128xf32, #tpu.memory_space<vmem>>, vector<128x128xf32>
      tpu.vector_store %arg9[%c0_14, %c0_15], %15 {strides = array<i32>} : memref<128x128xf32, #tpu.memory_space<vmem>>, vector<128x128xf32>,
    } else {
    }
    %c0 = arith.constant 0 : index
    %c0_1 = arith.constant 0 : index
    %3 = vector.load %arg3[%c0, %c0_1] : memref<128x128xbf16, #tpu.memory_space<vmem>>, vector<128x128xbf16>
    %c0_2 = arith.constant 0 : index
    %c0_3 = arith.constant 0 : index
    %4 = vector.load %arg4[%c0_2, %c0_3] : memref<128x128xbf16, #tpu.memory_space<vmem>>, vector<128x128xbf16>
    %cst = arith.constant dense<0.000000e+00> : vector<128x128xf32>
    %5 = tpu.matmul %3, %4, %cst {dimension_numbers = #tpu.dot_dimension_numbers<[1], [0], [0], [1], [0, 0, 1, 1], [], []>} : vector<128x128xbf16>, vector<128x128xbf16>, vector<128x128xf32> -> vector<128x128xf32>
    %c0_4 = arith.constant 0 : index
    %c0_5 = arith.constant 0 : index
    %6 = vector.load %arg9[%c0_4, %c0_5] : memref<128x128xf32, #tpu.memory_space<vmem>>, vector<128x128xf32>
    %c0_6 = arith.constant 0 : index
    %c0_7 = arith.constant 0 : index
    %7 = vector.load %arg2[%c0_6, %c0_7] : memref<128x128xbf16, #tpu.memory_space<vmem>>, vector<128x128xbf16>
    %8 = arith.truncf %5 : vector<128x128xf32> to vector<128x128xbf16>
    %cst_8 = arith.constant dense<0.000000e+00> : vector<128x128xf32>
    %9 = tpu.matmul %7, %8, %cst_8 {dimension_numbers = #tpu.dot_dimension_numbers<[1], [0], [0], [1], [0, 0, 1, 1], [], []>} : vector<128x128xbf16>, vector<128x128xbf16>, vector<128x128xf32> -> vector<128x128xf32>
    %10 = arith.addf %6, %9 : vector<128x128xf32>
    %c0_9 = arith.constant 0 : index
    %c0_10 = arith.constant 0 : index
    %11 = vector.load %arg9[%c0_9, %c0_10] : memref<128x128xf32, #tpu.memory_space<vmem>>, vector<128x128xf32>
    tpu.vector_store %arg9[%c0_9, %c0_10], %10 {strides = array<i32>} : memref<128x128xf32, #tpu.memory_space<vmem>>, vector<128x128xf32>,
    %c0_i32_11 = arith.constant 0 : i32
    %12 = arith.cmpi eq, %arg1, %c0_i32_11 : i32
    %13 = arith.extui %12 : i1 to i32
    %c0_i32_12 = arith.constant 0 : i32
    %14 = arith.cmpi ne, %13, %c0_i32_12 : i32
    scf.if %14 {
      %c0_13 = arith.constant 0 : index
      %c0_14 = arith.constant 0 : index
      %15 = vector.load %arg9[%c0_13, %c0_14] : memref<128x128xf32, #tpu.memory_space<vmem>>, vector<128x128xf32>
      %c0_15 = arith.constant 0 : index
      %c0_16 = arith.constant 0 : index
      %16 = vector.load %arg5[%c0_15, %c0_16] : memref<1x128xf32, #tpu.memory_space<vmem>>, vector<1x128xf32>
      %17 = vector.broadcast %16 : vector<1x128xf32> to vector<128x128xf32>
      %18 = arith.addf %15, %17 : vector<128x128xf32>
      %cst_17 = arith.constant 0.000000e+00 : f32
      %19 = vector.broadcast %cst_17 : f32 to vector<128x128xf32>
      %20 = arith.maximumf %18, %19 : vector<128x128xf32>
      %21 = arith.truncf %20 : vector<128x128xf32> to vector<128x128xbf16>
      %c0_18 = arith.constant 0 : index
      %c0_19 = arith.constant 0 : index
      %22 = vector.load %arg6[%c0_18, %c0_19] : memref<128x128xbf16, #tpu.memory_space<vmem>>, vector<128x128xbf16>
      %cst_20 = arith.constant dense<0.000000e+00> : vector<128x128xf32>
      %23 = tpu.matmul %21, %22, %cst_20 {dimension_numbers = #tpu.dot_dimension_numbers<[1], [0], [0], [1], [0, 0, 1, 1], [], []>} : vector<128x128xbf16>, vector<128x128xbf16>, vector<128x128xf32> -> vector<128x128xf32>
      %c0_21 = arith.constant 0 : index
      %c0_22 = arith.constant 0 : index
      %24 = vector.load %arg7[%c0_21, %c0_22] : memref<1x128xf32, #tpu.memory_space<vmem>>, vector<1x128xf32>
      %25 = vector.broadcast %24 : vector<1x128xf32> to vector<128x128xf32>
      %26 = arith.addf %23, %25 : vector<128x128xf32>
      %27 = math.tanh %26 : vector<128x128xf32>
      %c0_23 = arith.constant 0 : index
      %c0_24 = arith.constant 0 : index
      %28 = vector.load %arg8[%c0_23, %c0_24] : memref<128x128xf32, #tpu.memory_space<vmem>>, vector<128x128xf32>
      tpu.vector_store %arg8[%c0_23, %c0_24], %27 {strides = array<i32>} : memref<128x128xf32, #tpu.memory_space<vmem>>, vector<128x128xf32>,
    } else {
    }
    return
  }
  func.func @transform_0(%arg0: i32, %arg1: i32) -> (i32, i32) {
    %c0_i32 = arith.constant 0 : i32
    return %arg0, %arg1 : i32, i32
  }
  func.func @transform_1(%arg0: i32, %arg1: i32) -> (i32, i32) {
    %c0_i32 = arith.constant 0 : i32
    %c0_i32_0 = arith.constant 0 : i32
    return %arg1, %c0_i32 : i32, i32
  }
  func.func @transform_2(%arg0: i32, %arg1: i32) -> (i32, i32) {
    %c0_i32 = arith.constant 0 : i32
    %c0_i32_0 = arith.constant 0 : i32
    %c0_i32_1 = arith.constant 0 : i32
    return %c0_i32, %c0_i32_0 : i32, i32
  }
  func.func @transform_3(%arg0: i32, %arg1: i32) -> (i32, i32) {
    %c0_i32 = arith.constant 0 : i32
    %c0_i32_0 = arith.constant 0 : i32
    %c0_i32_1 = arith.constant 0 : i32
    return %c0_i32, %c0_i32_0 : i32, i32
  }
  func.func @transform_4(%arg0: i32, %arg1: i32) -> (i32, i32) {
    %c0_i32 = arith.constant 0 : i32
    %c0_i32_0 = arith.constant 0 : i32
    %c0_i32_1 = arith.constant 0 : i32
    return %c0_i32, %c0_i32_0 : i32, i32
  }
  func.func @transform_5(%arg0: i32, %arg1: i32) -> (i32, i32) {
    %c0_i32 = arith.constant 0 : i32
    %c0_i32_0 = arith.constant 0 : i32
    %c0_i32_1 = arith.constant 0 : i32
    return %c0_i32, %c0_i32_0 : i32, i32
  }
  func.func @transform_6(%arg0: i32, %arg1: i32) -> (i32, i32) {
    %c0_i32 = arith.constant 0 : i32
    %c0_i32_0 = arith.constant 0 : i32
    return %arg0, %c0_i32 : i32, i32
  }
}

</mosaic_0001>

<bundles_post_ra>
// kernel: vanilla_gcn_encoder.3
= control target key start
LH: loop header
LB: loop body
LE: loop exit
PB: predicated region body
PF: predicated region fallthrough
CT: control target
= control target key end

     0   :  { %s1247_s2 = inlined_call_operand.vmem [shape: bf16[128,128], index: 2, kind: input, shape index: {}]   ;;  %s1248_s1 = inlined_call_operand.vmem [shape: bf16[128,128], index: 1, kind: input, shape index: {}]   ;;  %s1249_s0 = inlined_call_operand.vmem [shape: bf16[128,128], index: 0, kind: input, shape index: {}]   ;;  %s1250_s4 = inlined_call_operand.vmem [shape: bf16[128,128], index: 4, kind: input, shape index: {}]   ;;  %s1251_s3 = inlined_call_operand.vmem [shape: f32[1,128], index: 3, kind: input, shape index: {}]   ;;  %s1252_s5 = inlined_call_operand.vmem [shape: f32[1,128], index: 5, kind: input, shape index: {}]   ;;  %s1253_s6 = inlined_call_operand.vmem [shape: f32[128,128], index: 6, kind: output, shape index: {}]  }
   0x1   :  { %v950_v0 = vld [vmem:[%s1247_s2] sm:$0xff]   ;;  %v951_v1 = vld [vmem:[%s1247_s2 + $0x8] sm:$0xff]   ;;  %v952_v2 = vld [vmem:[%s1247_s2 + $0x10] sm:$0xff]  }
   0x2   :  { %838 = vmatprep.subr.bf16.mxu0 %v950_v0  ;;  %v953_v3 = vld [vmem:[%s1247_s2 + $0x18] sm:$0xff]   ;;  %v958_v4 = vld [vmem:[%s1248_s1] sm:$0xff]   ;;  %v955_v6 = vld [vmem:[%s1247_s2 + $0x28] sm:$0xff]  }
   0x3   :  { %839 = vmatpush3.bf16.msra.mxu0 %v950_v0  ;;  %854 = vmatprep.mubr.bf16.mxu0 %v958_v4  ;;  %v954_v5 = vld [vmem:[%s1247_s2 + $0x20] sm:$0xff]   ;;  %v956_v7 = vld [vmem:[%s1247_s2 + $0x30] sm:$0xff]   ;;  %v957_v8 = vld [vmem:[%s1247_s2 + $0x38] sm:$0xff]  }
   0x4   :  { %840 = vmatprep.subr.bf16.mxu0 %v951_v1  ;;  %v959_v9 = vld [vmem:[%s1248_s1 + $0x8] sm:$0xff]   ;;  %v960_v10 = vld [vmem:[%s1248_s1 + $0x10] sm:$0xff]   ;;  %v961_v11 = vld [vmem:[%s1248_s1 + $0x18] sm:$0xff]  }
   0x5   :  { %v962_v12 = vld [vmem:[%s1248_s1 + $0x20] sm:$0xff]   ;;  %v963_v13 = vld [vmem:[%s1248_s1 + $0x28] sm:$0xff]   ;;  %v964_v14 = vld [vmem:[%s1248_s1 + $0x30] sm:$0xff]  }
   0x6   :  { %v965_v15 = vld [vmem:[%s1248_s1 + $0x38] sm:$0xff]   ;;  %v966_v16 = vld [vmem:[%s1249_s0] sm:$0xff]   ;;  %v1106_v18 = vld [vmem:[%s1250_s4 + $0x8] sm:$0xff]  }
   0x7   :  { %841 = vmatpush3.bf16.msra.mxu0 %v951_v1  ;;  %886 = vmatprep.mubr.bf16.mxu1 %v966_v16  ;;  %v974_v17 = vld [vmem:[%s1250_s4] sm:$0xff]   ;;  %v1112_v19 = vld [vmem:[%s1250_s4 + $0x10] sm:$0xff]   ;;  %v1119_v20 = vld [vmem:[%s1250_s4 + $0x18] sm:$0xff]  }
   0x8   :  { %842 = vmatprep.subr.bf16.mxu0 %v952_v2  ;;  %v1126_v21 = vld [vmem:[%s1250_s4 + $0x20] sm:$0xff]   ;;  %v1133_v22 = vld [vmem:[%s1250_s4 + $0x28] sm:$0xff]   ;;  %v968_v48 = vld [vmem:[%s1249_s0 + $0x10] sm:$0xff]  }
   0x9   :  { %v967_v47 = vld [vmem:[%s1249_s0 + $0x8] sm:$0xff]   ;;  %v969_v49 = vld [vmem:[%s1249_s0 + $0x18] sm:$0xff]   ;;  %v970_v50 = vld [vmem:[%s1249_s0 + $0x20] sm:$0xff]  }
   0xa   :  { %v971_v51 = vld [vmem:[%s1249_s0 + $0x28] sm:$0xff]   ;;  %v972_v52 = vld [vmem:[%s1249_s0 + $0x30] sm:$0xff]   ;;  %v973_v53 = vld [vmem:[%s1249_s0 + $0x38] sm:$0xff]  }
   0xb   :  { %843 = vmatpush3.bf16.msra.mxu0 %v952_v2  ;;  %v980_v54 = vld [vmem:[%s1250_s4 + $0x30] sm:$0xff]   ;;  %v981_v55 = vld [vmem:[%s1250_s4 + $0x38] sm:$0xff]   ;;  %v780_v56 = vld [vmem:[%s1251_s3] ss:$0 sm:$0xff] }
   0xc   :  { %844 = vmatprep.subr.bf16.mxu0 %v953_v3 }
   0xf   :  { %845 = vmatpush3.bf16.msra.mxu0 %v953_v3 }
  0x10   :  { %846 = vmatprep.subr.bf16.mxu0 %v954_v5 }
  0x13   :  { %847 = vmatpush3.bf16.msra.mxu0 %v954_v5 }
  0x14   :  { %848 = vmatprep.subr.bf16.mxu0 %v955_v6 }
  0x17   :  { %849 = vmatpush3.bf16.msra.mxu0 %v955_v6 }
  0x18   :  { %850 = vmatprep.subr.bf16.mxu0 %v956_v7 }
  0x1b   :  { %851 = vmatpush3.bf16.msra.mxu0 %v956_v7 }
  0x1c   :  { %852 = vmatprep.subr.bf16.mxu0 %v957_v8 }
  0x1f   :  { %853 = vmatpush3.bf16.msra.mxu0 %v957_v8 }
  0x20   :  { %902 = vmatprep.subr.bf16.mxu0 %v974_v17 }
  0x22   :  { %855 = vmatmul.mubr.bf16.vlgmr.msra.gmra.mrb[0].mxu0 %v959_v9 }
  0x23   :  { %858 = vmatprep.mubr.bf16.mxu0 %v960_v10  ;;  %903 = vmatpush3.bf16.msra.mxu0 %v974_v17 }
  0x24   :  { %904 = vmatprep.subr.bf16.mxu0 %v1106_v18 }
  0x27   :  { %905 = vmatpush3.bf16.msra.mxu0 %v1106_v18 }
  0x28   :  { %906 = vmatprep.subr.bf16.mxu0 %v1112_v19 }
  0x2a   :  { %859 = vmatmul.mubr.bf16.gmra.mrb[4].mxu0 %v961_v11 }
  0x2b   :  { %862 = vmatprep.mubr.bf16.mxu0 %v962_v12  ;;  %907 = vmatpush3.bf16.msra.mxu0 %v1112_v19 }
  0x2c   :  { %908 = vmatprep.subr.bf16.mxu0 %v1119_v20 }
  0x2f   :  { %909 = vmatpush3.bf16.msra.mxu0 %v1119_v20 }
  0x30   :  { %910 = vmatprep.subr.bf16.mxu0 %v1126_v21 }
  0x32   :  { %863 = vmatmul.mubr.bf16.gmra.mrb[8].mxu0 %v963_v13 }
  0x33   :  { %866 = vmatprep.mubr.bf16.mxu0 %v964_v14  ;;  %911 = vmatpush3.bf16.msra.mxu0 %v1126_v21 }
  0x34   :  { %912 = vmatprep.subr.bf16.mxu0 %v1133_v22 }
  0x37   :  { %913 = vmatpush3.bf16.msra.mxu0 %v1133_v22 }
  0x38   :  { %914 = vmatprep.subr.bf16.mxu0 %v980_v54 }
  0x3a   :  { %867 = vmatmul.mubr.bf16.gmra.mrb[12].mxu0 %v965_v15 }
  0x3b   :  { %915 = vmatpush3.bf16.msra.mxu0 %v980_v54 }
  0x3c   :  { %916 = vmatprep.subr.bf16.mxu0 %v981_v55 }
  0x3f   :  { %917 = vmatpush3.bf16.msra.mxu0 %v981_v55 }
  0xf5   :  { %v856_v23 = vpop.f32.mrb[0].mxu0 }
  0xf6   :  { %v206_v24 = vpop.f32.mrb[1].mxu0 }
  0xf7   :  { %v857_v25 = vpop.f32.mrb[2].mxu0 }
  0xf8   :  { %v302_v26 = vpack.c.bf16 %v857_v25, %v856_v23  ;;  %v209_v27 = vpop.f32.mrb[3].mxu0 }
  0xf9   :  { %v301_v28 = vpack.c.bf16 %v209_v27, %v206_v24 }
  0xfb   :  { %870 = vmatprep.subr.bf16.mxu1 %v301_v28 }
  0xfc   :  { %871 = vmatpush3.bf16.msra.mxu1 %v301_v28 }
  0xfd   :  { %v860_v29 = vpop.f32.mrb[4].mxu0  ;;  %872 = vmatprep.subr.bf16.mxu1 %v302_v26 }
  0xfe   :  { %v222_v30 = vpop.f32.mrb[5].mxu0 }
  0xff   :  { %v861_v31 = vpop.f32.mrb[6].mxu0 }
 0x100   :  { %v304_v32 = vpack.c.bf16 %v861_v31, %v860_v29  ;;  %v225_v33 = vpop.f32.mrb[7].mxu0  ;;  %873 = vmatpush3.bf16.msra.mxu1 %v302_v26 }
 0x101   :  { %v303_v34 = vpack.c.bf16 %v225_v33, %v222_v30 }
 0x103   :  { %874 = vmatprep.subr.bf16.mxu1 %v303_v34 }
 0x104   :  { %875 = vmatpush3.bf16.msra.mxu1 %v303_v34 }
 0x105   :  { %v864_v35 = vpop.f32.mrb[8].mxu0  ;;  %876 = vmatprep.subr.bf16.mxu1 %v304_v32 }
 0x106   :  { %v238_v36 = vpop.f32.mrb[9].mxu0 }
 0x107   :  { %v865_v37 = vpop.f32.mrb[10].mxu0 }
 0x108   :  { %v306_v38 = vpack.c.bf16 %v865_v37, %v864_v35  ;;  %v241_v39 = vpop.f32.mrb[11].mxu0  ;;  %877 = vmatpush3.bf16.msra.mxu1 %v304_v32 }
 0x109   :  { %v305_v40 = vpack.c.bf16 %v241_v39, %v238_v36 }
 0x10b   :  { %878 = vmatprep.subr.bf16.mxu1 %v305_v40 }
 0x10c   :  { %879 = vmatpush3.bf16.msra.mxu1 %v305_v40 }
 0x10d   :  { %v868_v41 = vpop.f32.mrb[12].mxu0  ;;  %880 = vmatprep.subr.bf16.mxu1 %v306_v38 }
 0x10e   :  { %v254_v42 = vpop.f32.mrb[13].mxu0 }
 0x10f   :  { %v869_v43 = vpop.f32.mrb[14].mxu0 }
 0x110   :  { %v308_v44 = vpack.c.bf16 %v869_v43, %v868_v41  ;;  %v257_v45 = vpop.f32.mrb[15].mxu0  ;;  %881 = vmatpush3.bf16.msra.mxu1 %v306_v38 }
 0x111   :  { %v307_v46 = vpack.c.bf16 %v257_v45, %v254_v42 }
 0x113   :  { %882 = vmatprep.subr.bf16.mxu1 %v307_v46 }
 0x114   :  { %883 = vmatpush3.bf16.msra.mxu1 %v307_v46 }
 0x115   :  { %884 = vmatprep.subr.bf16.mxu1 %v308_v44 }
 0x118   :  { %885 = vmatpush3.bf16.msra.mxu1 %v308_v44 }
 0x119   :  { %934 = vmatprep.subr.bf16.mxu1 %v974_v17 }
 0x11b   :  { %887 = vmatmul.mubr.bf16.vlgmr.msra.gmra.mrb[0].mxu1 %v967_v47 }
 0x11c   :  { %890 = vmatprep.mubr.bf16.mxu1 %v968_v48  ;;  %942 = vmatpush3.bf16.msra.mxu1 %v974_v17 }
 0x11d   :  { %935 = vmatprep.subr.bf16.mxu1 %v1106_v18 }
 0x120   :  { %943 = vmatpush3.bf16.msra.mxu1 %v1106_v18 }
 0x121   :  { %936 = vmatprep.subr.bf16.mxu1 %v1112_v19 }
 0x123   :  { %891 = vmatmul.mubr.bf16.gmra.mrb[4].mxu1 %v969_v49  ;;  %v1181_v49 = vld [vmem:[%s1252_s5] ss:$0 sm:$0xff] }
 0x124   :  { %894 = vmatprep.mubr.bf16.mxu1 %v970_v50  ;;  %944 = vmatpush3.bf16.msra.mxu1 %v1112_v19 }
 0x125   :  { %937 = vmatprep.subr.bf16.mxu1 %v1119_v20 }
 0x128   :  { %945 = vmatpush3.bf16.msra.mxu1 %v1119_v20 }
 0x129   :  { %938 = vmatprep.subr.bf16.mxu1 %v1126_v21 }
 0x12b   :  { %895 = vmatmul.mubr.bf16.gmra.mrb[8].mxu1 %v971_v51 }
 0x12c   :  { %898 = vmatprep.mubr.bf16.mxu1 %v972_v52  ;;  %946 = vmatpush3.bf16.msra.mxu1 %v1126_v21 }
 0x12d   :  { %939 = vmatprep.subr.bf16.mxu1 %v1133_v22 }
 0x130   :  { %947 = vmatpush3.bf16.msra.mxu1 %v1133_v22 }
 0x131   :  { %940 = vmatprep.subr.bf16.mxu1 %v980_v54 }
 0x133   :  { %899 = vmatmul.mubr.bf16.gmra.mrb[12].mxu1 %v973_v53 }
 0x134   :  { %948 = vmatpush3.bf16.msra.mxu1 %v980_v54 }
 0x135   :  { %941 = vmatprep.subr.bf16.mxu1 %v981_v55 }
 0x138   :  { %949 = vmatpush3.bf16.msra.mxu1 %v981_v55 }
 0x1ee   :  { %v888_v57 = vpop.f32.mrb[0].mxu1 }
 0x1ef   :  { %v514_v58 = vadd.f32 %v888_v57, %v780_v56  ;;  %v391_v59 = vpop.f32.mrb[1].mxu1 }
 0x1f0   :  { %v512_v60 = vadd.f32 %v780_v56, %v391_v59  ;;  %v889_v61 = vpop.f32.mrb[2].mxu1 }
 0x1f1   :  { %v515_v62 = vadd.f32 %v889_v61, %v780_v56  ;;  %v394_v63 = vpop.f32.mrb[3].mxu1  ;;  %v530_v1 = vmax.f32 %v514_v58, 0.0 }
 0x1f2   :  { %v513_v0 = vadd.f32 %v780_v56, %v394_v63  ;;  %v528_v3 = vmax.f32 %v512_v60, 0.0 }
 0x1f3   :  { %v531_v2 = vmax.f32 %v515_v62, 0.0 }
 0x1f4   :  { %v529_v4 = vmax.f32 %v513_v0, 0.0 }
 0x1f5   :  { %v545_v5 = vpack.c.bf16 %v531_v2, %v530_v1 }
 0x1f6   :  { %v544_v6 = vpack.c.bf16 %v529_v4, %v528_v3  ;;  %v892_v7 = vpop.f32.mrb[4].mxu1 }
 0x1f7   :  { %v518_v8 = vadd.f32 %v892_v7, %v780_v56  ;;  %v407_v9 = vpop.f32.mrb[5].mxu1 }
 0x1f8   :  { %v516_v10 = vadd.f32 %v780_v56, %v407_v9  ;;  %v893_v11 = vpop.f32.mrb[6].mxu1  ;;  %918 = vmatprep.mubr.bf16.mxu0 %v544_v6 }
 0x1f9   :  { %v519_v12 = vadd.f32 %v893_v11, %v780_v56  ;;  %v410_v13 = vpop.f32.mrb[7].mxu1  ;;  %919 = vmatmul.mubr.bf16.vlgmr.msra.gmra.mrb[16].mxu0 %v545_v5  ;;  %v534_v15 = vmax.f32 %v518_v8, 0.0 }
 0x1fa   :  { %v517_v14 = vadd.f32 %v780_v56, %v410_v13  ;;  %v532_v17 = vmax.f32 %v516_v10, 0.0 }
 0x1fb   :  { %v535_v16 = vmax.f32 %v519_v12, 0.0 }
 0x1fc   :  { %v533_v18 = vmax.f32 %v517_v14, 0.0 }
 0x1fd   :  { %v547_v19 = vpack.c.bf16 %v535_v16, %v534_v15 }
 0x1fe   :  { %v546_v20 = vpack.c.bf16 %v533_v18, %v532_v17  ;;  %v896_v21 = vpop.f32.mrb[8].mxu1 }
 0x1ff   :  { %v522_v22 = vadd.f32 %v896_v21, %v780_v56  ;;  %v423_v23 = vpop.f32.mrb[9].mxu1 }
 0x200   :  { %v520_v24 = vadd.f32 %v780_v56, %v423_v23  ;;  %v897_v25 = vpop.f32.mrb[10].mxu1  ;;  %922 = vmatprep.mubr.bf16.mxu0 %v546_v20 }
 0x201   :  { %v523_v26 = vadd.f32 %v897_v25, %v780_v56  ;;  %v426_v27 = vpop.f32.mrb[11].mxu1  ;;  %923 = vmatmul.mubr.bf16.gmra.mrb[20].mxu0 %v547_v19  ;;  %v538_v29 = vmax.f32 %v522_v22, 0.0 }
 0x202   :  { %v521_v28 = vadd.f32 %v780_v56, %v426_v27  ;;  %v536_v31 = vmax.f32 %v520_v24, 0.0 }
 0x203   :  { %v539_v30 = vmax.f32 %v523_v26, 0.0 }
 0x204   :  { %v537_v32 = vmax.f32 %v521_v28, 0.0 }
 0x205   :  { %v549_v33 = vpack.c.bf16 %v539_v30, %v538_v29 }
 0x206   :  { %v548_v34 = vpack.c.bf16 %v537_v32, %v536_v31  ;;  %v900_v35 = vpop.f32.mrb[12].mxu1 }
 0x207   :  { %v526_v36 = vadd.f32 %v900_v35, %v780_v56  ;;  %v439_v37 = vpop.f32.mrb[13].mxu1 }
 0x208   :  { %v524_v38 = vadd.f32 %v780_v56, %v439_v37  ;;  %v901_v39 = vpop.f32.mrb[14].mxu1  ;;  %926 = vmatprep.mubr.bf16.mxu1 %v548_v34 }
 0x209   :  { %v527_v40 = vadd.f32 %v901_v39, %v780_v56  ;;  %v442_v41 = vpop.f32.mrb[15].mxu1  ;;  %927 = vmatmul.mubr.bf16.vlgmr.msra.gmra.mrb[16].mxu1 %v549_v33  ;;  %v542_v43 = vmax.f32 %v526_v36, 0.0 }
 0x20a   :  { %v525_v42 = vadd.f32 %v780_v56, %v442_v41  ;;  %v540_v45 = vmax.f32 %v524_v38, 0.0 }
 0x20b   :  { %v543_v44 = vmax.f32 %v527_v40, 0.0 }
 0x20c   :  { %v541_v46 = vmax.f32 %v525_v42, 0.0 }
 0x20d   :  { %v551_v47 = vpack.c.bf16 %v543_v44, %v542_v43 }
 0x20e   :  { %v550_v48 = vpack.c.bf16 %v541_v46, %v540_v45 }
 0x210   :  { %930 = vmatprep.mubr.bf16.mxu1 %v550_v48 }
 0x211   :  { %931 = vmatmul.mubr.bf16.gmra.mrb[20].mxu1 %v551_v47 }
 0x2cc   :  { %v920_v50 = vpop.f32.mrb[16].mxu0 }
 0x2cd   :  { %v666_v51 = vadd.f32 %v920_v50, %v1181_v49  ;;  %v657_v52 = vpop.f32.mrb[17].mxu0 }
 0x2ce   :  { %v658_v53 = vadd.f32 %v1181_v49, %v657_v52  ;;  %v921_v54 = vpop.f32.mrb[18].mxu0 }
 0x2cf   :  { %982 = vtanh.f32 %v666_v51  ;;  %v669_v55 = vadd.f32 %v921_v54, %v1181_v49  ;;  %v660_v56 = vpop.f32.mrb[19].mxu0 }
 0x2d0   :  { %984 = vtanh.f32 %v658_v53  ;;  %v661_v57 = vadd.f32 %v1181_v49, %v660_v56 }
 0x2d1   :  { %986 = vtanh.f32 %v669_v55 }
 0x2d2   :  { %988 = vtanh.f32 %v661_v57 }
 0x2d4   :  { %v924_v58 = vpop.f32.mrb[20].mxu0 }
 0x2d5   :  { %v682_v59 = vadd.f32 %v924_v58, %v1181_v49  ;;  %v673_v60 = vpop.f32.mrb[21].mxu0 }
 0x2d6   :  { %v674_v61 = vadd.f32 %v1181_v49, %v673_v60  ;;  %v925_v62 = vpop.f32.mrb[22].mxu0 }
 0x2d7   :  { %990 = vtanh.f32 %v682_v59  ;;  %v685_v63 = vadd.f32 %v925_v62, %v1181_v49  ;;  %v676_v0 = vpop.f32.mrb[23].mxu0 }
 0x2d8   :  { %992 = vtanh.f32 %v674_v61  ;;  %v677_v1 = vadd.f32 %v1181_v49, %v676_v0 }
 0x2d9   :  { %v983_v2 = vpop.eup %982  ;;  %994 = vtanh.f32 %v685_v63 }
 0x2da   :  { %v985_v3 = vpop.eup %984  ;;  %738 = vst [vmem:[%s1253_s6 + $0x10] sm:$0xff] %v983_v2  ;;  %996 = vtanh.f32 %v677_v1 }
 0x2db   :  { %v987_v4 = vpop.eup %986  ;;  %736 = vst [vmem:[%s1253_s6] sm:$0xff] %v985_v3 }
 0x2dc   :  { %v989_v5 = vpop.eup %988  ;;  %739 = vst [vmem:[%s1253_s6 + $0x18] sm:$0xff] %v987_v4  ;;  %v928_v6 = vpop.f32.mrb[16].mxu1 }
 0x2dd   :  { %737 = vst [vmem:[%s1253_s6 + $0x8] sm:$0xff] %v989_v5  ;;  %v698_v7 = vadd.f32 %v928_v6, %v1181_v49  ;;  %v689_v8 = vpop.f32.mrb[17].mxu1 }
 0x2de   :  { %v690_v9 = vadd.f32 %v1181_v49, %v689_v8  ;;  %v929_v10 = vpop.f32.mrb[18].mxu1 }
 0x2df   :  { %998 = vtanh.f32 %v698_v7  ;;  %v701_v11 = vadd.f32 %v929_v10, %v1181_v49  ;;  %v692_v12 = vpop.f32.mrb[19].mxu1 }
 0x2e0   :  { %1000 = vtanh.f32 %v690_v9  ;;  %v693_v13 = vadd.f32 %v1181_v49, %v692_v12 }
 0x2e1   :  { %v991_v14 = vpop.eup %990  ;;  %1002 = vtanh.f32 %v701_v11 }
 0x2e2   :  { %v993_v15 = vpop.eup %992  ;;  %742 = vst [vmem:[%s1253_s6 + $0x30] sm:$0xff] %v991_v14  ;;  %1004 = vtanh.f32 %v693_v13 }
 0x2e3   :  { %v995_v16 = vpop.eup %994  ;;  %740 = vst [vmem:[%s1253_s6 + $0x20] sm:$0xff] %v993_v15 }
 0x2e4   :  { %v997_v17 = vpop.eup %996  ;;  %743 = vst [vmem:[%s1253_s6 + $0x38] sm:$0xff] %v995_v16  ;;  %v932_v18 = vpop.f32.mrb[20].mxu1 }
 0x2e5   :  { %741 = vst [vmem:[%s1253_s6 + $0x28] sm:$0xff] %v997_v17  ;;  %v714_v19 = vadd.f32 %v932_v18, %v1181_v49  ;;  %v705_v20 = vpop.f32.mrb[21].mxu1 }
 0x2e6   :  { %v706_v21 = vadd.f32 %v1181_v49, %v705_v20  ;;  %v933_v22 = vpop.f32.mrb[22].mxu1 }
 0x2e7   :  { %1006 = vtanh.f32 %v714_v19  ;;  %v717_v23 = vadd.f32 %v933_v22, %v1181_v49  ;;  %v708_v24 = vpop.f32.mrb[23].mxu1 }
 0x2e8   :  { %1008 = vtanh.f32 %v706_v21  ;;  %v709_v25 = vadd.f32 %v1181_v49, %v708_v24 }
 0x2e9   :  { %v999_v26 = vpop.eup %998  ;;  %1010 = vtanh.f32 %v717_v23 }
 0x2ea   :  { %v1001_v27 = vpop.eup %1000  ;;  %746 = vst [vmem:[%s1253_s6 + $0x50] sm:$0xff] %v999_v26  ;;  %1012 = vtanh.f32 %v709_v25 }
 0x2eb   :  { %v1003_v28 = vpop.eup %1002  ;;  %744 = vst [vmem:[%s1253_s6 + $0x40] sm:$0xff] %v1001_v27 }
 0x2ec   :  { %v1005_v29 = vpop.eup %1004  ;;  %747 = vst [vmem:[%s1253_s6 + $0x58] sm:$0xff] %v1003_v28 }
 0x2ed   :  { %745 = vst [vmem:[%s1253_s6 + $0x48] sm:$0xff] %v1005_v29 }
 0x2f1   :  { %v1007_v30 = vpop.eup %1006 }
 0x2f2   :  { %v1009_v31 = vpop.eup %1008  ;;  %750 = vst [vmem:[%s1253_s6 + $0x70] sm:$0xff] %v1007_v30 }
 0x2f3   :  { %v1011_v32 = vpop.eup %1010  ;;  %748 = vst [vmem:[%s1253_s6 + $0x60] sm:$0xff] %v1009_v31 }
 0x2f4   :  { %v1013_v33 = vpop.eup %1012  ;;  %751 = vst [vmem:[%s1253_s6 + $0x78] sm:$0xff] %v1011_v32 }
 0x2f5   :  { %749 = vst [vmem:[%s1253_s6 + $0x68] sm:$0xff] %v1013_v33 }

// kernel: vanilla_gcn_encoder.2
= control target key start
LH: loop header
LB: loop body
LE: loop exit
PB: predicated region body
PF: predicated region fallthrough
CT: control target
= control target key end

     0   :  { %s970_s2 = inlined_call_operand.vmem [shape: bf16[128,128], index: 2, kind: input, shape index: {}]   ;;  %s971_s1 = inlined_call_operand.vmem [shape: bf16[128,128], index: 1, kind: input, shape index: {}]   ;;  %s972_s0 = inlined_call_operand.vmem [shape: bf16[128,128], index: 0, kind: input, shape index: {}]   ;;  %s973_s3 = inlined_call_operand.vmem [shape: f32[1,128], index: 3, kind: input, shape index: {}]   ;;  %s974_s4 = inlined_call_operand.vmem [shape: bf16[128,128], index: 4, kind: output, shape index: {}]  }
   0x1   :  { %v822_v0 = vld [vmem:[%s970_s2] sm:$0xff]   ;;  %v823_v1 = vld [vmem:[%s970_s2 + $0x8] sm:$0xff]   ;;  %v824_v2 = vld [vmem:[%s970_s2 + $0x10] sm:$0xff]  }
   0x2   :  { %758 = vmatprep.subr.bf16.mxu0 %v822_v0  ;;  %v825_v3 = vld [vmem:[%s970_s2 + $0x18] sm:$0xff]   ;;  %v830_v4 = vld [vmem:[%s971_s1] sm:$0xff]   ;;  %v827_v6 = vld [vmem:[%s970_s2 + $0x28] sm:$0xff]  }
   0x3   :  { %759 = vmatpush3.bf16.msra.mxu0 %v822_v0  ;;  %774 = vmatprep.mubr.bf16.mxu0 %v830_v4  ;;  %v826_v5 = vld [vmem:[%s970_s2 + $0x20] sm:$0xff]   ;;  %v828_v7 = vld [vmem:[%s970_s2 + $0x30] sm:$0xff]   ;;  %v829_v8 = vld [vmem:[%s970_s2 + $0x38] sm:$0xff]  }
   0x4   :  { %760 = vmatprep.subr.bf16.mxu0 %v823_v1  ;;  %v831_v9 = vld [vmem:[%s971_s1 + $0x8] sm:$0xff]   ;;  %v832_v10 = vld [vmem:[%s971_s1 + $0x10] sm:$0xff]   ;;  %v833_v11 = vld [vmem:[%s971_s1 + $0x18] sm:$0xff]  }
   0x5   :  { %v834_v12 = vld [vmem:[%s971_s1 + $0x20] sm:$0xff]   ;;  %v835_v13 = vld [vmem:[%s971_s1 + $0x28] sm:$0xff]   ;;  %v836_v14 = vld [vmem:[%s971_s1 + $0x30] sm:$0xff]  }
   0x6   :  { %v837_v15 = vld [vmem:[%s971_s1 + $0x38] sm:$0xff]   ;;  %v838_v16 = vld [vmem:[%s972_s0] sm:$0xff]   ;;  %v839_v41 = vld [vmem:[%s972_s0 + $0x8] sm:$0xff]  }
   0x7   :  { %761 = vmatpush3.bf16.msra.mxu0 %v823_v1  ;;  %806 = vmatprep.mubr.bf16.mxu1 %v838_v16  ;;  %v840_v42 = vld [vmem:[%s972_s0 + $0x10] sm:$0xff]   ;;  %v841_v43 = vld [vmem:[%s972_s0 + $0x18] sm:$0xff]   ;;  %v842_v44 = vld [vmem:[%s972_s0 + $0x20] sm:$0xff]  }
   0x8   :  { %762 = vmatprep.subr.bf16.mxu0 %v824_v2  ;;  %v843_v45 = vld [vmem:[%s972_s0 + $0x28] sm:$0xff]   ;;  %v844_v46 = vld [vmem:[%s972_s0 + $0x30] sm:$0xff]   ;;  %v845_v47 = vld [vmem:[%s972_s0 + $0x38] sm:$0xff]  }
   0x9   :  { %v646_v48 = vld [vmem:[%s973_s3] ss:$0 sm:$0xff] }
   0xb   :  { %763 = vmatpush3.bf16.msra.mxu0 %v824_v2 }
   0xc   :  { %764 = vmatprep.subr.bf16.mxu0 %v825_v3 }
   0xf   :  { %765 = vmatpush3.bf16.msra.mxu0 %v825_v3 }
  0x10   :  { %766 = vmatprep.subr.bf16.mxu0 %v826_v5 }
  0x13   :  { %767 = vmatpush3.bf16.msra.mxu0 %v826_v5 }
  0x14   :  { %768 = vmatprep.subr.bf16.mxu0 %v827_v6 }
  0x17   :  { %769 = vmatpush3.bf16.msra.mxu0 %v827_v6 }
  0x18   :  { %770 = vmatprep.subr.bf16.mxu0 %v828_v7 }
  0x1b   :  { %771 = vmatpush3.bf16.msra.mxu0 %v828_v7 }
  0x1c   :  { %772 = vmatprep.subr.bf16.mxu0 %v829_v8 }
  0x1f   :  { %773 = vmatpush3.bf16.msra.mxu0 %v829_v8 }
  0x22   :  { %775 = vmatmul.mubr.bf16.vlgmr.msra.gmra.mrb[0].mxu0 %v831_v9 }
  0x23   :  { %778 = vmatprep.mubr.bf16.mxu0 %v832_v10 }
  0x2a   :  { %779 = vmatmul.mubr.bf16.gmra.mrb[4].mxu0 %v833_v11 }
  0x2b   :  { %782 = vmatprep.mubr.bf16.mxu0 %v834_v12 }
  0x32   :  { %783 = vmatmul.mubr.bf16.gmra.mrb[8].mxu0 %v835_v13 }
  0x33   :  { %786 = vmatprep.mubr.bf16.mxu0 %v836_v14 }
  0x3a   :  { %787 = vmatmul.mubr.bf16.gmra.mrb[12].mxu0 %v837_v15 }
  0xf5   :  { %v776_v17 = vpop.f32.mrb[0].mxu0 }
  0xf6   :  { %v200_v18 = vpop.f32.mrb[1].mxu0 }
  0xf7   :  { %v777_v19 = vpop.f32.mrb[2].mxu0 }
  0xf8   :  { %v296_v20 = vpack.c.bf16 %v777_v19, %v776_v17  ;;  %v203_v21 = vpop.f32.mrb[3].mxu0 }
  0xf9   :  { %v295_v22 = vpack.c.bf16 %v203_v21, %v200_v18 }
  0xfb   :  { %790 = vmatprep.subr.bf16.mxu1 %v295_v22 }
  0xfc   :  { %791 = vmatpush3.bf16.msra.mxu1 %v295_v22 }
  0xfd   :  { %v780_v23 = vpop.f32.mrb[4].mxu0  ;;  %792 = vmatprep.subr.bf16.mxu1 %v296_v20 }
  0xfe   :  { %v216_v24 = vpop.f32.mrb[5].mxu0 }
  0xff   :  { %v781_v25 = vpop.f32.mrb[6].mxu0 }
 0x100   :  { %v298_v26 = vpack.c.bf16 %v781_v25, %v780_v23  ;;  %v219_v27 = vpop.f32.mrb[7].mxu0  ;;  %793 = vmatpush3.bf16.msra.mxu1 %v296_v20 }
 0x101   :  { %v297_v28 = vpack.c.bf16 %v219_v27, %v216_v24 }
 0x103   :  { %794 = vmatprep.subr.bf16.mxu1 %v297_v28 }
 0x104   :  { %795 = vmatpush3.bf16.msra.mxu1 %v297_v28 }
 0x105   :  { %v784_v29 = vpop.f32.mrb[8].mxu0  ;;  %796 = vmatprep.subr.bf16.mxu1 %v298_v26 }
 0x106   :  { %v232_v30 = vpop.f32.mrb[9].mxu0 }
 0x107   :  { %v785_v31 = vpop.f32.mrb[10].mxu0 }
 0x108   :  { %v300_v32 = vpack.c.bf16 %v785_v31, %v784_v29  ;;  %v235_v33 = vpop.f32.mrb[11].mxu0  ;;  %797 = vmatpush3.bf16.msra.mxu1 %v298_v26 }
 0x109   :  { %v299_v34 = vpack.c.bf16 %v235_v33, %v232_v30 }
 0x10b   :  { %798 = vmatprep.subr.bf16.mxu1 %v299_v34 }
 0x10c   :  { %799 = vmatpush3.bf16.msra.mxu1 %v299_v34 }
 0x10d   :  { %v788_v35 = vpop.f32.mrb[12].mxu0  ;;  %800 = vmatprep.subr.bf16.mxu1 %v300_v32 }
 0x10e   :  { %v248_v36 = vpop.f32.mrb[13].mxu0 }
 0x10f   :  { %v789_v37 = vpop.f32.mrb[14].mxu0 }
 0x110   :  { %v302_v38 = vpack.c.bf16 %v789_v37, %v788_v35  ;;  %v251_v39 = vpop.f32.mrb[15].mxu0  ;;  %801 = vmatpush3.bf16.msra.mxu1 %v300_v32 }
 0x111   :  { %v301_v40 = vpack.c.bf16 %v251_v39, %v248_v36 }
 0x113   :  { %802 = vmatprep.subr.bf16.mxu1 %v301_v40 }
 0x114   :  { %803 = vmatpush3.bf16.msra.mxu1 %v301_v40 }
 0x115   :  { %804 = vmatprep.subr.bf16.mxu1 %v302_v38 }
 0x118   :  { %805 = vmatpush3.bf16.msra.mxu1 %v302_v38 }
 0x11b   :  { %807 = vmatmul.mubr.bf16.vlgmr.msra.gmra.mrb[0].mxu1 %v839_v41 }
 0x11c   :  { %810 = vmatprep.mubr.bf16.mxu1 %v840_v42 }
 0x123   :  { %811 = vmatmul.mubr.bf16.gmra.mrb[4].mxu1 %v841_v43 }
 0x124   :  { %814 = vmatprep.mubr.bf16.mxu1 %v842_v44 }
 0x12b   :  { %815 = vmatmul.mubr.bf16.gmra.mrb[8].mxu1 %v843_v45 }
 0x12c   :  { %818 = vmatprep.mubr.bf16.mxu1 %v844_v46 }
 0x133   :  { %819 = vmatmul.mubr.bf16.gmra.mrb[12].mxu1 %v845_v47 }
 0x1ee   :  { %v808_v49 = vpop.f32.mrb[0].mxu1 }
 0x1ef   :  { %v508_v50 = vadd.f32 %v808_v49, %v646_v48  ;;  %v385_v51 = vpop.f32.mrb[1].mxu1 }
 0x1f0   :  { %v506_v52 = vadd.f32 %v646_v48, %v385_v51  ;;  %v809_v53 = vpop.f32.mrb[2].mxu1 }
 0x1f1   :  { %v509_v54 = vadd.f32 %v809_v53, %v646_v48  ;;  %v388_v55 = vpop.f32.mrb[3].mxu1  ;;  %v524_v57 = vmax.f32 %v508_v50, 0.0 }
 0x1f2   :  { %v507_v56 = vadd.f32 %v646_v48, %v388_v55  ;;  %v522_v59 = vmax.f32 %v506_v52, 0.0 }
 0x1f3   :  { %v525_v58 = vmax.f32 %v509_v54, 0.0 }
 0x1f4   :  { %v523_v60 = vmax.f32 %v507_v56, 0.0 }
 0x1f5   :  { %v687_v61 = vpack.c.bf16 %v525_v58, %v524_v57 }
 0x1f6   :  { %v682_v62 = vpack.c.bf16 %v523_v60, %v522_v59  ;;  %v812_v63 = vpop.f32.mrb[4].mxu1 }
 0x1f7   :  { %719 = vst [vmem:[%s974_s4 + $0x8] sm:$0xff] %v687_v61   ;;  %v512_v0 = vadd.f32 %v812_v63, %v646_v48  ;;  %v401_v1 = vpop.f32.mrb[5].mxu1 }
 0x1f8   :  { %683 = vst [vmem:[%s974_s4] sm:$0xff] %v682_v62   ;;  %v510_v2 = vadd.f32 %v646_v48, %v401_v1  ;;  %v813_v3 = vpop.f32.mrb[6].mxu1 }
 0x1f9   :  { %v513_v4 = vadd.f32 %v813_v3, %v646_v48  ;;  %v404_v5 = vpop.f32.mrb[7].mxu1  ;;  %v528_v7 = vmax.f32 %v512_v0, 0.0 }
 0x1fa   :  { %v511_v6 = vadd.f32 %v646_v48, %v404_v5  ;;  %v526_v9 = vmax.f32 %v510_v2, 0.0 }
 0x1fb   :  { %v529_v8 = vmax.f32 %v513_v4, 0.0 }
 0x1fc   :  { %v527_v10 = vmax.f32 %v511_v6, 0.0 }
 0x1fd   :  { %v697_v11 = vpack.c.bf16 %v529_v8, %v528_v7 }
 0x1fe   :  { %v692_v12 = vpack.c.bf16 %v527_v10, %v526_v9  ;;  %v816_v13 = vpop.f32.mrb[8].mxu1 }
 0x1ff   :  { %721 = vst [vmem:[%s974_s4 + $0x18] sm:$0xff] %v697_v11   ;;  %v516_v14 = vadd.f32 %v816_v13, %v646_v48  ;;  %v417_v15 = vpop.f32.mrb[9].mxu1 }
 0x200   :  { %720 = vst [vmem:[%s974_s4 + $0x10] sm:$0xff] %v692_v12   ;;  %v514_v16 = vadd.f32 %v646_v48, %v417_v15  ;;  %v817_v17 = vpop.f32.mrb[10].mxu1 }
 0x201   :  { %v517_v18 = vadd.f32 %v817_v17, %v646_v48  ;;  %v420_v19 = vpop.f32.mrb[11].mxu1  ;;  %v532_v21 = vmax.f32 %v516_v14, 0.0 }
 0x202   :  { %v515_v20 = vadd.f32 %v646_v48, %v420_v19  ;;  %v530_v23 = vmax.f32 %v514_v16, 0.0 }
 0x203   :  { %v533_v22 = vmax.f32 %v517_v18, 0.0 }
 0x204   :  { %v531_v24 = vmax.f32 %v515_v20, 0.0 }
 0x205   :  { %v707_v25 = vpack.c.bf16 %v533_v22, %v532_v21 }
 0x206   :  { %v702_v26 = vpack.c.bf16 %v531_v24, %v530_v23  ;;  %v820_v27 = vpop.f32.mrb[12].mxu1 }
 0x207   :  { %723 = vst [vmem:[%s974_s4 + $0x28] sm:$0xff] %v707_v25   ;;  %v520_v28 = vadd.f32 %v820_v27, %v646_v48  ;;  %v433_v29 = vpop.f32.mrb[13].mxu1 }
 0x208   :  { %722 = vst [vmem:[%s974_s4 + $0x20] sm:$0xff] %v702_v26   ;;  %v518_v30 = vadd.f32 %v646_v48, %v433_v29  ;;  %v821_v31 = vpop.f32.mrb[14].mxu1 }
 0x209   :  { %v521_v32 = vadd.f32 %v821_v31, %v646_v48  ;;  %v436_v33 = vpop.f32.mrb[15].mxu1  ;;  %v536_v35 = vmax.f32 %v520_v28, 0.0 }
 0x20a   :  { %v519_v34 = vadd.f32 %v646_v48, %v436_v33  ;;  %v534_v37 = vmax.f32 %v518_v30, 0.0 }
 0x20b   :  { %v537_v36 = vmax.f32 %v521_v32, 0.0 }
 0x20c   :  { %v535_v38 = vmax.f32 %v519_v34, 0.0 }
 0x20d   :  { %v717_v39 = vpack.c.bf16 %v537_v36, %v536_v35 }
 0x20e   :  { %v712_v40 = vpack.c.bf16 %v535_v38, %v534_v37 }
 0x20f   :  { %725 = vst [vmem:[%s974_s4 + $0x38] sm:$0xff] %v717_v39  }
 0x210   :  { %724 = vst [vmem:[%s974_s4 + $0x30] sm:$0xff] %v712_v40  }

</bundles_post_ra>
